<compile_context>
chip_gen: v5e
topology: v5e:2x2
jax: 0.10.0
libtpu: 0.0.40
codegen_flags: <defaults>
</compile_context>

<pallas_src>
import jax
import jax.numpy as jnp
from jax.experimental import pallas as pl
from jax.experimental.pallas import tpu as pltpu

N_EXPERTS = 5
HIDDEN = 10
IN_FEATURES = 1
LANE = 128
MAX_TILE_B = 32 * 1024  # batch columns per grid step for large batches


def gating_kernel(x_ref, w1_ref, b1_ref, w2_ref, b2_ref, o_ref):
    # Feature-major layout: batch is the lane (last) axis.
    x = x_ref[...]          # (1, TB)
    w1 = w1_ref[...]        # (HIDDEN, 1)
    b1 = b1_ref[...]        # (HIDDEN, 1)
    w2 = w2_ref[...]        # (N_EXPERTS, HIDDEN)
    b2 = b2_ref[...]        # (N_EXPERTS, 1)

    # Linear(1, 10) + ReLU.  in_features == 1 -> rank-1 outer product on VPU.
    h = jnp.maximum(w1 * x + b1, 0.0)                          # (HIDDEN, TB)

    # Linear(10, n_experts): (5, 10) @ (10, TB) -> (5, TB) on the MXU;
    # batch stays on the lane axis so the result and stores are lane-dense.
    logits = jnp.dot(w2, h, preferred_element_type=jnp.float32) + b2

    # Softmax over the expert axis (axis 0 here == torch Softmax(dim=1)).
    m = jnp.max(logits, axis=0, keepdims=True)                 # (1, TB)
    e = jnp.exp(logits - m)                                    # (5, TB)
    denom = jnp.sum(e, axis=0, keepdims=True)                  # (1, TB)
    inv = pl.reciprocal(denom, approx=True)                    # EUP path
    inv = inv * (2.0 - denom * inv)                            # Newton step -> ~f32 exact
    o_ref[...] = e * inv


def _round_up(n, m):
    return ((n + m - 1) // m) * m


def gating_network(x, w1, b1, w2, b2, *, max_tile_b=MAX_TILE_B):
    """x: (B, 1) float32.  Weights in torch-native layout (see header). -> (B, 5)."""
    B = x.shape[0]
    xT = x.astype(jnp.float32).T                               # (1, B)

    # Adaptive tile: single step for small batches (pad only to 128), big
    # lane-dense tiles for large batches so per-step overhead amortizes.
    if B <= max_tile_b:
        tile_b = max(_round_up(B, LANE), LANE)
        n_tiles = 1
    else:
        tile_b = max_tile_b
        n_tiles = pl.cdiv(B, tile_b)
    Bp = n_tiles * tile_b
    if Bp != B:
        xT = jnp.pad(xT, ((0, 0), (0, Bp - B)))                # zero-pad: softmax stays finite

    # Weights/biases: full-array blocks with constant index_maps -> fetched
    # once, VMEM-resident across all grid steps.
    def resident(shape):
        nd = len(shape)
        return pl.BlockSpec(shape, lambda i, _nd=nd: (0,) * _nd)

    out = pl.pallas_call(
        gating_kernel,
        out_shape=jax.ShapeDtypeStruct((N_EXPERTS, Bp), jnp.float32),
        grid=(n_tiles,),
        in_specs=[
            pl.BlockSpec((1, tile_b), lambda i: (0, i)),       # x streams over batch
            resident(w1.shape),
            resident(b1.shape),
            resident(w2.shape),
            resident(b2.shape),
        ],
        out_specs=pl.BlockSpec((N_EXPERTS, tile_b), lambda i: (0, i)),
        compiler_params=pltpu.CompilerParams(
            dimension_semantics=("parallel",),                 # v7x: shard batch across TCs
            vmem_limit_bytes=32 * 1024 * 1024,                 # ~2 MB used; explicit for v7x
        ),
    )(xT, w1, b1, w2, b2)

    return out[:, :B].T                                        # (B, N_EXPERTS)


def init_params(key):
    # Deterministic synthetic init; shapes match torch Linear(1,10), Linear(10,5).
    k1, k2, k3, k4 = jax.random.split(key, 4)
    w1 = jax.random.uniform(k1, (HIDDEN, IN_FEATURES), jnp.float32, -1.0, 1.0)   # (10, 1)
    b1 = jax.random.uniform(k2, (HIDDEN, 1), jnp.float32, -1.0, 1.0)             # (10, 1)
    w2 = jax.random.uniform(k3, (N_EXPERTS, HIDDEN), jnp.float32, -0.3, 0.3)     # (5, 10)
    b2 = jax.random.uniform(k4, (N_EXPERTS, 1), jnp.float32, -0.3, 0.3)          # (5, 1)
    return w1, b1, w2, b2


def reference(x, w1, b1, w2, b2):
    h = jnp.maximum(x @ w1.T + b1[:, 0], 0.0)                  # (B, 10)
    logits = h @ w2.T + b2[:, 0]                               # (B, 5)
    return jax.nn.softmax(logits, axis=1)


if __name__ == "__main__":
    key = jax.random.PRNGKey(0)
    kx, kp, kx2 = jax.random.split(key, 3)
    w1, b1, w2, b2 = init_params(kp)

    # Small smoke test (matches the module's tiny input shape): single grid step.
    B = 8
    x = jax.random.normal(kx, (B, IN_FEATURES), jnp.float32)
    out = jax.block_until_ready(gating_network(x, w1, b1, w2, b2))
    ref = reference(x, w1, b1, w2, b2)
    assert out.shape == (B, N_EXPERTS)
    assert jnp.allclose(out, ref, atol=1e-5, rtol=1e-5)
    assert jnp.allclose(jnp.sum(out, axis=1), jnp.ones((B,)), atol=1e-5)

    # Larger ragged batch with a small forced tile: exercises the multi-step
    # grid and tail-padding path.
    B2 = 2300
    x2 = jax.random.normal(kx2, (B2, IN_FEATURES), jnp.float32)
    out2 = jax.block_until_ready(gating_network(x2, w1, b1, w2, b2, max_tile_b=512))
    ref2 = reference(x2, w1, b1, w2, b2)
    assert out2.shape == (B2, N_EXPERTS)
    assert jnp.allclose(out2, ref2, atol=1e-5, rtol=1e-5)
    assert jnp.allclose(jnp.sum(out2, axis=1), jnp.ones((B2,)), atol=1e-5)

    print("KERNEL_OK")
</pallas_src>

<mosaic_0001>
module attributes {stable_mosaic.version = 11 : i64} {
  func.func @gating_kernel(%arg0: i32, %arg1: memref<1x128xf32, #tpu.memory_space<vmem>>, %arg2: memref<10x1xf32, #tpu.memory_space<vmem>>, %arg3: memref<10x1xf32, #tpu.memory_space<vmem>>, %arg4: memref<5x10xf32, #tpu.memory_space<vmem>>, %arg5: memref<5x1xf32, #tpu.memory_space<vmem>>, %arg6: memref<5x128xf32, #tpu.memory_space<vmem>>) attributes {dimension_semantics = [#tpu.dimension_semantics<parallel>], iteration_bounds = array<i64: 1>, scalar_prefetch = 0 : i64, scratch_operands = 0 : i64, tpu.core_type = #tpu.core_type<tc>, window_params = [{transform_indices = @transform_0, window_bounds = array<i64: 1, 128>}, {pipeline_mode = #tpu.pipeline_mode<synchronous>, transform_indices = @transform_1, window_bounds = array<i64: 10, 1>}, {pipeline_mode = #tpu.pipeline_mode<synchronous>, transform_indices = @transform_2, window_bounds = array<i64: 10, 1>}, {pipeline_mode = #tpu.pipeline_mode<synchronous>, transform_indices = @transform_3, window_bounds = array<i64: 5, 10>}, {pipeline_mode = #tpu.pipeline_mode<synchronous>, transform_indices = @transform_4, window_bounds = array<i64: 5, 1>}, {transform_indices = @transform_5, window_bounds = array<i64: 5, 128>}]} {
    %c0 = arith.constant 0 : index
    %c0_0 = arith.constant 0 : index
    %0 = vector.load %arg1[%c0, %c0_0] : memref<1x128xf32, #tpu.memory_space<vmem>>, vector<1x128xf32>
    %c0_1 = arith.constant 0 : index
    %c0_2 = arith.constant 0 : index
    %1 = vector.load %arg2[%c0_1, %c0_2] : memref<10x1xf32, #tpu.memory_space<vmem>>, vector<10x1xf32>
    %c0_3 = arith.constant 0 : index
    %c0_4 = arith.constant 0 : index
    %2 = vector.load %arg3[%c0_3, %c0_4] : memref<10x1xf32, #tpu.memory_space<vmem>>, vector<10x1xf32>
    %c0_5 = arith.constant 0 : index
    %c0_6 = arith.constant 0 : index
    %3 = vector.load %arg4[%c0_5, %c0_6] : memref<5x10xf32, #tpu.memory_space<vmem>>, vector<5x10xf32>
    %c0_7 = arith.constant 0 : index
    %c0_8 = arith.constant 0 : index
    %4 = vector.load %arg5[%c0_7, %c0_8] : memref<5x1xf32, #tpu.memory_space<vmem>>, vector<5x1xf32>
    %5 = vector.broadcast %1 : vector<10x1xf32> to vector<10x128xf32>
    %6 = vector.broadcast %0 : vector<1x128xf32> to vector<10x128xf32>
    %7 = arith.mulf %5, %6 : vector<10x128xf32>
    %8 = vector.broadcast %2 : vector<10x1xf32> to vector<10x128xf32>
    %9 = arith.addf %7, %8 : vector<10x128xf32>
    %cst = arith.constant 0.000000e+00 : f32
    %10 = vector.broadcast %cst : f32 to vector<10x128xf32>
    %11 = arith.maximumf %9, %10 : vector<10x128xf32>
    %cst_9 = arith.constant dense<0.000000e+00> : vector<5x128xf32>
    %12 = tpu.matmul %3, %11, %cst_9 {dimension_numbers = #tpu.dot_dimension_numbers<[1], [0], [0], [1], [0, 0, 1, 1], [], []>} : vector<5x10xf32>, vector<10x128xf32>, vector<5x128xf32> -> vector<5x128xf32>
    %13 = vector.broadcast %4 : vector<5x1xf32> to vector<5x128xf32>
    %14 = arith.addf %12, %13 : vector<5x128xf32>
    %cst_10 = arith.constant dense<0xFF800000> : vector<128xf32>
    %15 = vector.multi_reduction <maximumf>, %14, %cst_10 [0] : vector<5x128xf32> to vector<128xf32>
    %16 = vector.shape_cast %15 : vector<128xf32> to vector<1x128xf32>
    %17 = vector.broadcast %16 : vector<1x128xf32> to vector<5x128xf32>
    %18 = arith.subf %14, %17 : vector<5x128xf32>
    %19 = math.exp %18 : vector<5x128xf32>
    %cst_11 = arith.constant dense<0.000000e+00> : vector<128xf32>
    %20 = vector.multi_reduction <add>, %19, %cst_11 [0] : vector<5x128xf32> to vector<128xf32>
    %21 = vector.shape_cast %20 : vector<128xf32> to vector<1x128xf32>
    %22 = tpu.reciprocal %21 {approx = true} : vector<1x128xf32> -> vector<1x128xf32>
    %23 = arith.mulf %21, %22 : vector<1x128xf32>
    %cst_12 = arith.constant 2.000000e+00 : f32
    %24 = vector.broadcast %cst_12 : f32 to vector<1x128xf32>
    %25 = arith.subf %24, %23 : vector<1x128xf32>
    %26 = arith.mulf %22, %25 : vector<1x128xf32>
    %27 = vector.broadcast %26 : vector<1x128xf32> to vector<5x128xf32>
    %28 = arith.mulf %19, %27 : vector<5x128xf32>
    %c0_13 = arith.constant 0 : index
    %c0_14 = arith.constant 0 : index
    %29 = vector.load %arg6[%c0_13, %c0_14] : memref<5x128xf32, #tpu.memory_space<vmem>>, vector<5x128xf32>
    tpu.vector_store %arg6[%c0_13, %c0_14], %28 {strides = array<i32>} : memref<5x128xf32, #tpu.memory_space<vmem>>, vector<5x128xf32>,
    return
  }
  func.func @transform_0(%arg0: i32) -> (i32, i32) {
    %c0_i32 = arith.constant 0 : i32
    %c0_i32_0 = arith.constant 0 : i32
    return %c0_i32, %arg0 : i32, i32
  }
  func.func @transform_1(%arg0: i32) -> (i32, i32) {
    %c0_i32 = arith.constant 0 : i32
    %c0_i32_0 = arith.constant 0 : i32
    %c0_i32_1 = arith.constant 0 : i32
    return %c0_i32, %c0_i32_0 : i32, i32
  }
  func.func @transform_2(%arg0: i32) -> (i32, i32) {
    %c0_i32 = arith.constant 0 : i32
    %c0_i32_0 = arith.constant 0 : i32
    %c0_i32_1 = arith.constant 0 : i32
    return %c0_i32, %c0_i32_0 : i32, i32
  }
  func.func @transform_3(%arg0: i32) -> (i32, i32) {
    %c0_i32 = arith.constant 0 : i32
    %c0_i32_0 = arith.constant 0 : i32
    %c0_i32_1 = arith.constant 0 : i32
    return %c0_i32, %c0_i32_0 : i32, i32
  }
  func.func @transform_4(%arg0: i32) -> (i32, i32) {
    %c0_i32 = arith.constant 0 : i32
    %c0_i32_0 = arith.constant 0 : i32
    %c0_i32_1 = arith.constant 0 : i32
    return %c0_i32, %c0_i32_0 : i32, i32
  }
  func.func @transform_5(%arg0: i32) -> (i32, i32) {
    %c0_i32 = arith.constant 0 : i32
    %c0_i32_0 = arith.constant 0 : i32
    return %c0_i32, %arg0 : i32, i32
  }
}

</mosaic_0001>

<bundles_post_ra>
// kernel: tpu_custom_call.1
= control target key start
LH: loop header
LB: loop body
LE: loop exit
PB: predicated region body
PF: predicated region fallthrough
CT: control target
= control target key end

     0   :  { %v168_v2 = vmov 0   ;;  %s224_s0 = inlined_call_operand.vmem [shape: f32[1,128], index: 0, kind: input, shape index: {}]   ;;  %s225_s1 = inlined_call_operand.vmem [shape: f32[10,1], index: 1, kind: input, shape index: {}]   ;;  %s226_s2 = inlined_call_operand.vmem [shape: f32[10,1], index: 2, kind: input, shape index: {}]   ;;  %s227_s3 = inlined_call_operand.vmem [shape: f32[5,10], index: 3, kind: input, shape index: {}]   ;;  %s228_s4 = inlined_call_operand.vmem [shape: f32[5,1], index: 4, kind: input, shape index: {}]   ;;  %s229_s5 = inlined_call_operand.hbm [shape: f32[5,128], index: 5, kind: output, shape index: {}]  }
   0x1   :  { %v25_v0 = vld [vmem:[%s226_s2 + $0x8] sm:$0x3]  ;;  %135 = vset.pattern.permute.xlu1 %v168_v2  ;;  %134 = vset.pattern.permute.xlu0 %v168_v2 }
   0x2   :  { %v23_v1 = vld [vmem:[%s225_s1 + $0x8] sm:$0x3] }
   0x3   :  { %10 = vsyncpa [#allocation3], 0  ;;  %50 = vperm.xlu1 %135, %v25_v0   ;;  %35 = vperm.xlu0 %134, %v23_v1   ;;  %v24_v3 = vld [vmem:[%s226_s2] sm:$0xff]  ;;  %vm66_vm0 = vcmask 1041408   ;;  %vm62_vm1 = vcmask 80896   ;;  %vm90_vm2 = vcmask 1044480  }
   0x4   :  { %136 = vset.pattern.permute.xlu2 %v168_v2  ;;  %v22_v4 = vld [vmem:[%s225_s1] sm:$0xff]  ;;  %s121_s6 = sshll.u32 %s229_s5, 4  ;;  %s122_s6 = int_to_ptr.hbm [resolvable:$true] %s121_s6 }
   0x5   :  { %v27_v5 = vld [vmem:[%s228_s4] sm:$0x1f] }
   0x6   :  { %59 = vperm.xlu2 %136, %v27_v5   ;;  %v137_v6 = vld [vmem:[%s224_s0] ss:$0 sm:$0xff]  ;;  %s169_s0 = smov [#allocation2]  }
   0x7   :  { %v26_v17 = vld [vmem:[%s227_s3] sm:$0x1f]  ;;  %s119_s3 = sshll.u32 %s169_s0, 4  ;;  %s120_s3 = int_to_ptr.vmem [resolvable:$true] %s119_s3 }
   0xb   :  { %45 = vperm.xlu1 %135, %v24_v3   ;;  %30 = vperm.xlu0 %134, %v22_v4  }
  0x60   :  { %v60_v18 = vpop.permute.xlu2 %59 }
  0x75   :  { %v51_v7 = vpop.permute.xlu1 %50  ;;  %v36_v8 = vpop.permute.xlu0 %35 }
  0x76   :  { %v42_v9 = vmul.f32 %v137_v6, %v36_v8 }
  0x78   :  { %v54_v10 = vadd.f32 %v51_v7, %v42_v9 }
  0x7a   :  { %v56_v11 = vmax.f32 %v54_v10, 0.0 }
  0x7c   :  { %130 = vmatpush.msk.msra.mxu0 %vm66_vm0, %v56_v11 }
  0x7d   :  { %v31_v12 = vpop.permute.xlu0 %30  ;;  %v46_v14 = vpop.permute.xlu1 %45 }
  0x7e   :  { %v41_v13 = vmul.f32 %v137_v6, %v31_v12 }
  0x80   :  { %v53_v15 = vadd.f32 %v46_v14, %v41_v13 }
  0x82   :  { %v55_v16 = vmax.f32 %v53_v15, 0.0 }
  0x84   :  { %85 = vmatpush.msra.mxu0 %v55_v16 }
  0x85   :  { %131 = vmatmul.msk.f32.vlgmr.msra.gmra.mxu0 %vm62_vm1, %v26_v17 }
 0x102   :  { %v87_v19 = vpop.f32.mrf.mxu0 }
 0x103   :  { %v88_v20 = vadd.f32 %v87_v19, %v60_v18 }
 0x105   :  { %v91_v21 = vsel %vm90_vm2, %v88_v20, -inf }
 0x106   :  { %v92_v22 = vrot.slane %v91_v21, 4 }
 0x108   :  { %v93_v23 = vmax.f32 %v91_v21, %v92_v22 }
 0x10a   :  { %v94_v24 = vrot.slane %v93_v23, 2 }
 0x10c   :  { %v95_v25 = vmax.f32 %v93_v23, %v94_v24 }
 0x10e   :  { %v96_v26 = vrot.slane %v95_v25, 1 }
 0x110   :  { %v97_v27 = vmax.f32 %v95_v25, %v96_v26 }
 0x112   :  { %v98_v28 = vsub.f32 %v88_v20, %v97_v27 }
 0x114   :  { %v99_v29 = vmul.f32 1.442695, %v98_v28 }
 0x116   :  { %138 = vpow2.f32 %v99_v29 }
 0x11c   :  { %v139_v30 = vpop.eup %138 }
 0x11d   :  { %v101_v31 = vsel %vm90_vm2, %v139_v30, 0.0 }
 0x11e   :  { %v102_v32 = vrot.slane %v101_v31, 4 }
 0x120   :  { %v103_v33 = vadd.f32 %v102_v32, %v101_v31 }
 0x122   :  { %v104_v34 = vrot.slane %v103_v33, 2 }
 0x124   :  { %v105_v35 = vadd.f32 %v104_v34, %v103_v33 }
 0x126   :  { %v106_v36 = vrot.slane %v105_v35, 1 }
 0x128   :  { %v107_v37 = vadd.f32 %v106_v36, %v105_v35 }
 0x12a   :  { %140 = vrcp.f32 %v107_v37 }
 0x130   :  { %v141_v38 = vpop.eup %140 }
 0x131   :  { %v109_v39 = vmul.f32 %v141_v38, %v107_v37 }
 0x133   :  { %v110_v40 = vsub.f32 2.0, %v109_v39 }
 0x135   :  { %v111_v41 = vmul.f32 %v141_v38, %v110_v40 }
 0x137   :  { %v112_v42 = vmul.f32 %v139_v30, %v111_v41 }
 0x139   :  { %113 = vst [vmem:[#allocation2] sm:$0x1f] %v112_v42 }
 0x13a   :  { %124 = dma.vmem_to_hbm [thread:$0]  %s120_s3, 128, %s122_s6, [#allocation3]  }
 0x13b   :  { %166 = dma.done.wait [#allocation3], 128  }
 0x13c   :  { %167 = vsyncadd [#allocation3], 4294967168 }
 0x13d   :  { %129 = vsyncpa [#allocation3], 1 }

</bundles_post_ra>
